<compile_context>
chip_gen: v7x
topology: tpu7x:2x2x1
jax: 0.10.0
libtpu: 0.0.40
codegen_flags: <defaults>
</compile_context>

<pallas_src>
import functools
import math

import jax
import jax.numpy as jnp
from jax.experimental import pallas as pl
from jax.experimental.pallas import tpu as pltpu


# ---------------------------------------------------------------------------
# helpers
# ---------------------------------------------------------------------------

def _round_up(x, m):
    return ((x + m - 1) // m) * m


def _fit(dim, tile, align):
    """Return (padded_dim, tile) with padded_dim % tile == 0 and tile aligned."""
    p = _round_up(dim, align)
    if p <= tile:
        return p, p
    return _round_up(p, tile), tile


# ---------------------------------------------------------------------------
# Pallas kernels
# ---------------------------------------------------------------------------

def _linear_kernel(x_ref, w_ref, b_ref, o_ref, acc_ref, *, activation):
    """Tiled matmul with fp32 accumulator; bias (+ optional ReLU) on last k step."""

    @pl.when(pl.program_id(2) == 0)
    def _():
        acc_ref[...] = jnp.zeros_like(acc_ref)

    acc_ref[...] += jnp.dot(
        x_ref[...], w_ref[...], preferred_element_type=jnp.float32
    )

    @pl.when(pl.program_id(2) == pl.num_programs(2) - 1)
    def _():
        y = acc_ref[...] + b_ref[...]
        if activation == "relu":
            y = jnp.maximum(y, 0.0)
        o_ref[...] = y.astype(o_ref.dtype)


def _add_ln_kernel(x_ref, y_ref, g_ref, b_ref, o_ref, *, eps):
    """Fused residual add + LayerNorm over the last (lane) axis."""
    z = x_ref[...] + y_ref[...]
    mu = jnp.mean(z, axis=-1, keepdims=True)
    var = jnp.mean((z - mu) ** 2, axis=-1, keepdims=True)
    o_ref[...] = (z - mu) * jax.lax.rsqrt(var + eps) * g_ref[...] + b_ref[...]


def _attention_kernel(q_ref, k_ref, v_ref, o_ref, *, scale):
    """All heads of one batch element per grid step. Blocks: (1, H, S, dh)."""
    q = q_ref[0].astype(jnp.bfloat16)   # (H, S, dh)
    k = k_ref[0].astype(jnp.bfloat16)
    v = v_ref[0].astype(jnp.bfloat16)
    s = jnp.einsum("hqd,hkd->hqk", q, k,
                   preferred_element_type=jnp.float32) * scale
    s = s - jnp.max(s, axis=-1, keepdims=True)
    p = jnp.exp(s)
    p = p * pl.reciprocal(jnp.sum(p, axis=-1, keepdims=True), approx=True)
    o = jnp.einsum("hqk,hkd->hqd", p.astype(jnp.bfloat16), v,
                   preferred_element_type=jnp.float32)
    o_ref[0] = o


# ---------------------------------------------------------------------------
# Pallas wrappers
# ---------------------------------------------------------------------------

def linear(x2d, w, b, activation=None, tm=256, tn=256, tk=256):
    """y = act(x2d @ w + b).  x2d: (M, K) f32, w: (K, N) f32, b: (1, N) f32."""
    M, K = x2d.shape
    N = w.shape[1]

    Mp, tm = _fit(M, tm, 8)
    Kp, tk = _fit(K, tk, 128)
    Np, tn = _fit(N, tn, 128)

    xp = jnp.pad(x2d, ((0, Mp - M), (0, Kp - K))).astype(jnp.bfloat16)
    wp = jnp.pad(w, ((0, Kp - K), (0, Np - N))).astype(jnp.bfloat16)
    bp = jnp.pad(b, ((0, 0), (0, Np - N)))

    out = pl.pallas_call(
        functools.partial(_linear_kernel, activation=activation),
        out_shape=jax.ShapeDtypeStruct((Mp, Np), jnp.float32),
        grid=(Mp // tm, Np // tn, Kp // tk),
        in_specs=[
            pl.BlockSpec((tm, tk), lambda i, j, k: (i, k)),
            pl.BlockSpec((tk, tn), lambda i, j, k: (k, j)),
            pl.BlockSpec((1, tn), lambda i, j, k: (0, j)),
        ],
        out_specs=pl.BlockSpec((tm, tn), lambda i, j, k: (i, j)),
        scratch_shapes=[pltpu.VMEM((tm, tn), jnp.float32)],
        compiler_params=pltpu.CompilerParams(
            dimension_semantics=("parallel", "parallel", "arbitrary")),
    )(xp, wp, bp)
    return out[:M, :N]


def add_layernorm(x2d, y2d, gamma, beta, eps=1e-5, tm=256):
    """LayerNorm(x2d + y2d) row-tiled; feature dim stays whole on the lane axis."""
    M, D = x2d.shape
    Mp, tm = _fit(M, tm, 8)
    xp = jnp.pad(x2d, ((0, Mp - M), (0, 0)))
    yp = jnp.pad(y2d, ((0, Mp - M), (0, 0)))

    out = pl.pallas_call(
        functools.partial(_add_ln_kernel, eps=eps),
        out_shape=jax.ShapeDtypeStruct((Mp, D), jnp.float32),
        grid=(Mp // tm,),
        in_specs=[
            pl.BlockSpec((tm, D), lambda i: (i, 0)),
            pl.BlockSpec((tm, D), lambda i: (i, 0)),
            pl.BlockSpec((1, D), lambda i: (0, 0)),
            pl.BlockSpec((1, D), lambda i: (0, 0)),
        ],
        out_specs=pl.BlockSpec((tm, D), lambda i: (i, 0)),
        compiler_params=pltpu.CompilerParams(
            dimension_semantics=("parallel",)),
    )(xp, yp, gamma, beta)
    return out[:M]


def mha_attention(q, k, v, scale):
    """q, k, v: (B, H, S, dh); softmax(q k^T * scale) v, all heads per grid step."""
    B, H, S, dh = q.shape
    spec = pl.BlockSpec((1, H, S, dh), lambda i: (i, 0, 0, 0))
    return pl.pallas_call(
        functools.partial(_attention_kernel, scale=scale),
        out_shape=jax.ShapeDtypeStruct((B, H, S, dh), jnp.float32),
        grid=(B,),
        in_specs=[spec, spec, spec],
        out_specs=spec,
        compiler_params=pltpu.CompilerParams(
            dimension_semantics=("parallel",)),
    )(q, k, v)


# ---------------------------------------------------------------------------
# Parameter init (deterministic, synthetic)
# ---------------------------------------------------------------------------

def init_params(key, emb_dim, hidden_dim, ff_dim, num_layers):
    def dense(k, fan_in, fan_out):
        kw, kb = jax.random.split(k)
        w = jax.random.normal(kw, (fan_in, fan_out), jnp.float32) * (
            1.0 / math.sqrt(fan_in)
        )
        b = jax.random.normal(kb, (1, fan_out), jnp.float32) * 0.01
        return w, b

    keys = jax.random.split(key, 1 + num_layers)
    map_w, map_b = dense(keys[0], emb_dim, hidden_dim)
    layers = []
    for li in range(num_layers):
        lk = jax.random.split(keys[1 + li], 6)
        wq, bq = dense(lk[0], hidden_dim, hidden_dim)
        wk, bk = dense(lk[1], hidden_dim, hidden_dim)
        wv, bv = dense(lk[2], hidden_dim, hidden_dim)
        wo, bo = dense(lk[3], hidden_dim, hidden_dim)
        w1, b1 = dense(lk[4], hidden_dim, ff_dim)
        w2, b2 = dense(lk[5], ff_dim, hidden_dim)
        layers.append(
            dict(
                # fused QKV projection weights
                wqkv=jnp.concatenate([wq, wk, wv], axis=1),
                bqkv=jnp.concatenate([bq, bk, bv], axis=1),
                wo=wo, bo=bo,
                w1=w1, b1=b1, w2=w2, b2=b2,
                ln1_g=jnp.ones((1, hidden_dim), jnp.float32),
                ln1_b=jnp.zeros((1, hidden_dim), jnp.float32),
                ln2_g=jnp.ones((1, hidden_dim), jnp.float32),
                ln2_b=jnp.zeros((1, hidden_dim), jnp.float32),
            )
        )
    return dict(map_w=map_w, map_b=map_b, layers=layers)


# ---------------------------------------------------------------------------
# Transformer_Encoder.forward
# ---------------------------------------------------------------------------

def transformer_encoder(src, params, nhead):
    B, S, E = src.shape
    hidden = params["map_w"].shape[1]
    dh = hidden // nhead
    scale = 1.0 / math.sqrt(dh)

    # output = self.map(src)
    x = linear(src.reshape(B * S, E), params["map_w"], params["map_b"])

    def to_heads(t):   # (B*S, hidden) -> (B, nhead, S, dh)
        return t.reshape(B, S, nhead, dh).transpose(0, 2, 1, 3)

    # for mod in self.layers: output = mod(output, seq_len=lens)
    for lp in params["layers"]:
        # fused Q/K/V projection
        qkv = linear(x, lp["wqkv"], lp["bqkv"])
        q, k, v = jnp.split(qkv, 3, axis=1)
        attn = mha_attention(to_heads(q), to_heads(k), to_heads(v), scale)
        attn = attn.transpose(0, 2, 1, 3).reshape(B * S, hidden)
        attn_out = linear(attn, lp["wo"], lp["bo"])
        x = add_layernorm(x, attn_out, lp["ln1_g"], lp["ln1_b"])
        ff = linear(
            linear(x, lp["w1"], lp["b1"], activation="relu"),
            lp["w2"], lp["b2"],
        )
        x = add_layernorm(x, ff, lp["ln2_g"], lp["ln2_b"])

    # self.norm is None -> no final norm.
    return x.reshape(B, S, hidden)


# ---------------------------------------------------------------------------

if __name__ == "__main__":
    B, S = 2, 8
    EMB_DIM, HIDDEN_DIM, FF_DIM = 16, 32, 64
    NUM_LAYERS, NHEAD = 2, 4

    root = jax.random.PRNGKey(0)
    k_x, k_p = jax.random.split(root)
    src = jax.random.normal(k_x, (B, S, EMB_DIM), jnp.float32)
    params = init_params(k_p, EMB_DIM, HIDDEN_DIM, FF_DIM, NUM_LAYERS)

    fwd = jax.jit(functools.partial(transformer_encoder, nhead=NHEAD))
    out = fwd(src, params)
    jax.block_until_ready(out)
    assert out.shape == (B, S, HIDDEN_DIM)
    assert bool(jnp.all(jnp.isfinite(out)))
    print("KERNEL_OK")
</pallas_src>

<mosaic_0001>
module attributes {stable_mosaic.version = 11 : i64} {
  func.func @_linear_kernel(%arg0: i32, %arg1: i32, %arg2: i32, %arg3: memref<16x128xbf16, #tpu.memory_space<vmem>>, %arg4: memref<128x128xbf16, #tpu.memory_space<vmem>>, %arg5: memref<1x128xf32, #tpu.memory_space<vmem>>, %arg6: memref<16x128xf32, #tpu.memory_space<vmem>>, %arg7: memref<16x128xf32, #tpu.memory_space<vmem>>) attributes {dimension_semantics = [#tpu.dimension_semantics<parallel>, #tpu.dimension_semantics<parallel>, #tpu.dimension_semantics<arbitrary>], iteration_bounds = array<i64: 1, 1, 1>, scalar_prefetch = 0 : i64, scratch_operands = 1 : i64, tpu.core_type = #tpu.core_type<tc>, window_params = [{transform_indices = @transform_0, window_bounds = array<i64: 16, 128>}, {transform_indices = @transform_1, window_bounds = array<i64: 128, 128>}, {transform_indices = @transform_2, window_bounds = array<i64: 1, 128>}, {transform_indices = @transform_3, window_bounds = array<i64: 16, 128>}]} {
    %c0_i32 = arith.constant 0 : i32
    %0 = arith.cmpi eq, %arg2, %c0_i32 : i32
    %1 = arith.extui %0 : i1 to i32
    %c0_i32_0 = arith.constant 0 : i32
    %2 = arith.cmpi ne, %1, %c0_i32_0 : i32
    scf.if %2 {
      %cst_10 = arith.constant 0.000000e+00 : f32
      %12 = vector.broadcast %cst_10 : f32 to vector<16x128xf32>
      %c0_11 = arith.constant 0 : index
      %c0_12 = arith.constant 0 : index
      %13 = vector.load %arg7[%c0_11, %c0_12] : memref<16x128xf32, #tpu.memory_space<vmem>>, vector<16x128xf32>
      tpu.vector_store %arg7[%c0_11, %c0_12], %12 {strides = array<i32>} : memref<16x128xf32, #tpu.memory_space<vmem>>, vector<16x128xf32>,
    } else {
    }
    %c0 = arith.constant 0 : index
    %c0_1 = arith.constant 0 : index
    %3 = vector.load %arg7[%c0, %c0_1] : memref<16x128xf32, #tpu.memory_space<vmem>>, vector<16x128xf32>
    %c0_2 = arith.constant 0 : index
    %c0_3 = arith.constant 0 : index
    %4 = vector.load %arg3[%c0_2, %c0_3] : memref<16x128xbf16, #tpu.memory_space<vmem>>, vector<16x128xbf16>
    %c0_4 = arith.constant 0 : index
    %c0_5 = arith.constant 0 : index
    %5 = vector.load %arg4[%c0_4, %c0_5] : memref<128x128xbf16, #tpu.memory_space<vmem>>, vector<128x128xbf16>
    %cst = arith.constant dense<0.000000e+00> : vector<16x128xf32>
    %6 = tpu.matmul %4, %5, %cst {dimension_numbers = #tpu.dot_dimension_numbers<[1], [0], [0], [1], [0, 0, 1, 1], [], []>} : vector<16x128xbf16>, vector<128x128xbf16>, vector<16x128xf32> -> vector<16x128xf32>
    %7 = arith.addf %3, %6 : vector<16x128xf32>
    %c0_6 = arith.constant 0 : index
    %c0_7 = arith.constant 0 : index
    %8 = vector.load %arg7[%c0_6, %c0_7] : memref<16x128xf32, #tpu.memory_space<vmem>>, vector<16x128xf32>
    tpu.vector_store %arg7[%c0_6, %c0_7], %7 {strides = array<i32>} : memref<16x128xf32, #tpu.memory_space<vmem>>, vector<16x128xf32>,
    %c0_i32_8 = arith.constant 0 : i32
    %9 = arith.cmpi eq, %arg2, %c0_i32_8 : i32
    %10 = arith.extui %9 : i1 to i32
    %c0_i32_9 = arith.constant 0 : i32
    %11 = arith.cmpi ne, %10, %c0_i32_9 : i32
    scf.if %11 {
      %c0_10 = arith.constant 0 : index
      %c0_11 = arith.constant 0 : index
      %12 = vector.load %arg7[%c0_10, %c0_11] : memref<16x128xf32, #tpu.memory_space<vmem>>, vector<16x128xf32>
      %c0_12 = arith.constant 0 : index
      %c0_13 = arith.constant 0 : index
      %13 = vector.load %arg5[%c0_12, %c0_13] : memref<1x128xf32, #tpu.memory_space<vmem>>, vector<1x128xf32>
      %14 = vector.broadcast %13 : vector<1x128xf32> to vector<16x128xf32>
      %15 = arith.addf %12, %14 : vector<16x128xf32>
      %c0_14 = arith.constant 0 : index
      %c0_15 = arith.constant 0 : index
      %16 = vector.load %arg6[%c0_14, %c0_15] : memref<16x128xf32, #tpu.memory_space<vmem>>, vector<16x128xf32>
      tpu.vector_store %arg6[%c0_14, %c0_15], %15 {strides = array<i32>} : memref<16x128xf32, #tpu.memory_space<vmem>>, vector<16x128xf32>,
    } else {
    }
    return
  }
  func.func @transform_0(%arg0: i32, %arg1: i32, %arg2: i32) -> (i32, i32) {
    %c0_i32 = arith.constant 0 : i32
    return %arg0, %arg2 : i32, i32
  }
  func.func @transform_1(%arg0: i32, %arg1: i32, %arg2: i32) -> (i32, i32) {
    %c0_i32 = arith.constant 0 : i32
    return %arg2, %arg1 : i32, i32
  }
  func.func @transform_2(%arg0: i32, %arg1: i32, %arg2: i32) -> (i32, i32) {
    %c0_i32 = arith.constant 0 : i32
    %c0_i32_0 = arith.constant 0 : i32
    return %c0_i32, %arg1 : i32, i32
  }
  func.func @transform_3(%arg0: i32, %arg1: i32, %arg2: i32) -> (i32, i32) {
    %c0_i32 = arith.constant 0 : i32
    return %arg0, %arg1 : i32, i32
  }
}

module attributes {stable_mosaic.version = 11 : i64} {
  func.func @_attention_kernel(%arg0: i32, %arg1: memref<1x4x8x8xf32, #tpu.memory_space<vmem>>, %arg2: memref<1x4x8x8xf32, #tpu.memory_space<vmem>>, %arg3: memref<1x4x8x8xf32, #tpu.memory_space<vmem>>, %arg4: memref<1x4x8x8xf32, #tpu.memory_space<vmem>>) attributes {dimension_semantics = [#tpu.dimension_semantics<parallel>], iteration_bounds = array<i64: 2>, scalar_prefetch = 0 : i64, scratch_operands = 0 : i64, tpu.core_type = #tpu.core_type<tc>, window_params = [{transform_indices = @transform_0, window_bounds = array<i64: 1, 4, 8, 8>}, {transform_indices = @transform_1, window_bounds = array<i64: 1, 4, 8, 8>}, {transform_indices = @transform_2, window_bounds = array<i64: 1, 4, 8, 8>}, {transform_indices = @transform_3, window_bounds = array<i64: 1, 4, 8, 8>}]} {
    %c0 = arith.constant 0 : index
    %c0_0 = arith.constant 0 : index
    %c0_1 = arith.constant 0 : index
    %c0_2 = arith.constant 0 : index
    %0 = vector.load %arg1[%c0, %c0_0, %c0_1, %c0_2] : memref<1x4x8x8xf32, #tpu.memory_space<vmem>>, vector<1x4x8x8xf32>
    %1 = vector.shape_cast %0 : vector<1x4x8x8xf32> to vector<4x8x8xf32>
    %2 = arith.truncf %1 : vector<4x8x8xf32> to vector<4x8x8xbf16>
    %c0_3 = arith.constant 0 : index
    %c0_4 = arith.constant 0 : index
    %c0_5 = arith.constant 0 : index
    %c0_6 = arith.constant 0 : index
    %3 = vector.load %arg2[%c0_3, %c0_4, %c0_5, %c0_6] : memref<1x4x8x8xf32, #tpu.memory_space<vmem>>, vector<1x4x8x8xf32>
    %4 = vector.shape_cast %3 : vector<1x4x8x8xf32> to vector<4x8x8xf32>
    %5 = arith.truncf %4 : vector<4x8x8xf32> to vector<4x8x8xbf16>
    %c0_7 = arith.constant 0 : index
    %c0_8 = arith.constant 0 : index
    %c0_9 = arith.constant 0 : index
    %c0_10 = arith.constant 0 : index
    %6 = vector.load %arg3[%c0_7, %c0_8, %c0_9, %c0_10] : memref<1x4x8x8xf32, #tpu.memory_space<vmem>>, vector<1x4x8x8xf32>
    %7 = vector.shape_cast %6 : vector<1x4x8x8xf32> to vector<4x8x8xf32>
    %8 = arith.truncf %7 : vector<4x8x8xf32> to vector<4x8x8xbf16>
    "tpu.trace_start"() <{level = 10 : i32, message = "hqd,hkd->hqk"}> : () -> ()
    %cst = arith.constant dense<0.000000e+00> : vector<4x8x8xf32>
    %9 = tpu.matmul %2, %5, %cst {dimension_numbers = #tpu.dot_dimension_numbers<[2], [2], [1], [1], [0, 0, 0, 1, 1, 1], [0], [0]>} : vector<4x8x8xbf16>, vector<4x8x8xbf16>, vector<4x8x8xf32> -> vector<4x8x8xf32>
    "tpu.trace_stop"() : () -> ()
    %cst_11 = arith.constant 0.353553385 : f32
    %10 = vector.broadcast %cst_11 : f32 to vector<4x8x8xf32>
    %11 = arith.mulf %9, %10 : vector<4x8x8xf32>
    %cst_12 = arith.constant dense<0xFF800000> : vector<4x8xf32>
    %12 = vector.multi_reduction <maximumf>, %11, %cst_12 [2] : vector<4x8x8xf32> to vector<4x8xf32>
    %13 = vector.shape_cast %12 : vector<4x8xf32> to vector<4x8x1xf32>
    %14 = vector.broadcast %13 : vector<4x8x1xf32> to vector<4x8x8xf32>
    %15 = arith.subf %11, %14 : vector<4x8x8xf32>
    %16 = math.exp %15 : vector<4x8x8xf32>
    %cst_13 = arith.constant dense<0.000000e+00> : vector<4x8xf32>
    %17 = vector.multi_reduction <add>, %16, %cst_13 [2] : vector<4x8x8xf32> to vector<4x8xf32>
    %18 = vector.shape_cast %17 : vector<4x8xf32> to vector<4x8x1xf32>
    %19 = tpu.reciprocal %18 {approx = true} : vector<4x8x1xf32> -> vector<4x8x1xf32>
    %20 = vector.broadcast %19 : vector<4x8x1xf32> to vector<4x8x8xf32>
    %21 = arith.mulf %16, %20 : vector<4x8x8xf32>
    %22 = arith.truncf %21 : vector<4x8x8xf32> to vector<4x8x8xbf16>
    "tpu.trace_start"() <{level = 10 : i32, message = "hqk,hkd->hqd"}> : () -> ()
    %cst_14 = arith.constant dense<0.000000e+00> : vector<4x8x8xf32>
    %23 = tpu.matmul %22, %8, %cst_14 {dimension_numbers = #tpu.dot_dimension_numbers<[2], [1], [1], [2], [0, 0, 0, 1, 1, 2], [0], [0]>} : vector<4x8x8xbf16>, vector<4x8x8xbf16>, vector<4x8x8xf32> -> vector<4x8x8xf32>
    "tpu.trace_stop"() : () -> ()
    %c0_15 = arith.constant 0 : index
    %c0_16 = arith.constant 0 : index
    %c0_17 = arith.constant 0 : index
    %c0_18 = arith.constant 0 : index
    %24 = vector.load %arg4[%c0_15, %c0_16, %c0_17, %c0_18] : memref<1x4x8x8xf32, #tpu.memory_space<vmem>>, vector<1x4x8x8xf32>
    %25 = vector.shape_cast %24 : vector<1x4x8x8xf32> to vector<4x8x8xf32>
    %26 = vector.shape_cast %23 : vector<4x8x8xf32> to vector<1x4x8x8xf32>
    tpu.vector_store %arg4[%c0_15, %c0_16, %c0_17, %c0_18], %26 {strides = array<i32>} : memref<1x4x8x8xf32, #tpu.memory_space<vmem>>, vector<1x4x8x8xf32>,
    return
  }
  func.func @transform_0(%arg0: i32) -> (i32, i32, i32, i32) {
    %c0_i32 = arith.constant 0 : i32
    %c0_i32_0 = arith.constant 0 : i32
    %c0_i32_1 = arith.constant 0 : i32
    %c0_i32_2 = arith.constant 0 : i32
    return %arg0, %c0_i32, %c0_i32_0, %c0_i32_1 : i32, i32, i32, i32
  }
  func.func @transform_1(%arg0: i32) -> (i32, i32, i32, i32) {
    %c0_i32 = arith.constant 0 : i32
    %c0_i32_0 = arith.constant 0 : i32
    %c0_i32_1 = arith.constant 0 : i32
    %c0_i32_2 = arith.constant 0 : i32
    return %arg0, %c0_i32, %c0_i32_0, %c0_i32_1 : i32, i32, i32, i32
  }
  func.func @transform_2(%arg0: i32) -> (i32, i32, i32, i32) {
    %c0_i32 = arith.constant 0 : i32
    %c0_i32_0 = arith.constant 0 : i32
    %c0_i32_1 = arith.constant 0 : i32
    %c0_i32_2 = arith.constant 0 : i32
    return %arg0, %c0_i32, %c0_i32_0, %c0_i32_1 : i32, i32, i32, i32
  }
  func.func @transform_3(%arg0: i32) -> (i32, i32, i32, i32) {
    %c0_i32 = arith.constant 0 : i32
    %c0_i32_0 = arith.constant 0 : i32
    %c0_i32_1 = arith.constant 0 : i32
    %c0_i32_2 = arith.constant 0 : i32
    return %arg0, %c0_i32, %c0_i32_0, %c0_i32_1 : i32, i32, i32, i32
  }
}

module attributes {stable_mosaic.version = 11 : i64} {
  func.func @_add_ln_kernel(%arg0: i32, %arg1: memref<16x32xf32, #tpu.memory_space<vmem>>, %arg2: memref<16x32xf32, #tpu.memory_space<vmem>>, %arg3: memref<1x32xf32, #tpu.memory_space<vmem>>, %arg4: memref<1x32xf32, #tpu.memory_space<vmem>>, %arg5: memref<16x32xf32, #tpu.memory_space<vmem>>) attributes {dimension_semantics = [#tpu.dimension_semantics<parallel>], iteration_bounds = array<i64: 1>, scalar_prefetch = 0 : i64, scratch_operands = 0 : i64, tpu.core_type = #tpu.core_type<tc>, window_params = [{transform_indices = @transform_0, window_bounds = array<i64: 16, 32>}, {transform_indices = @transform_1, window_bounds = array<i64: 16, 32>}, {pipeline_mode = #tpu.pipeline_mode<synchronous>, transform_indices = @transform_2, window_bounds = array<i64: 1, 32>}, {pipeline_mode = #tpu.pipeline_mode<synchronous>, transform_indices = @transform_3, window_bounds = array<i64: 1, 32>}, {transform_indices = @transform_4, window_bounds = array<i64: 16, 32>}]} {
    %c0 = arith.constant 0 : index
    %c0_0 = arith.constant 0 : index
    %0 = vector.load %arg1[%c0, %c0_0] : memref<16x32xf32, #tpu.memory_space<vmem>>, vector<16x32xf32>
    %c0_1 = arith.constant 0 : index
    %c0_2 = arith.constant 0 : index
    %1 = vector.load %arg2[%c0_1, %c0_2] : memref<16x32xf32, #tpu.memory_space<vmem>>, vector<16x32xf32>
    %2 = arith.addf %0, %1 : vector<16x32xf32>
    %cst = arith.constant dense<0.000000e+00> : vector<16xf32>
    %3 = vector.multi_reduction <add>, %2, %cst [1] : vector<16x32xf32> to vector<16xf32>
    %4 = vector.shape_cast %3 : vector<16xf32> to vector<16x1xf32>
    %cst_3 = arith.constant 3.200000e+01 : f32
    %5 = vector.broadcast %cst_3 : f32 to vector<16x1xf32>
    %6 = arith.divf %4, %5 : vector<16x1xf32>
    %7 = vector.broadcast %6 : vector<16x1xf32> to vector<16x32xf32>
    %8 = arith.subf %2, %7 : vector<16x32xf32>
    %9 = arith.mulf %8, %8 : vector<16x32xf32>
    %cst_4 = arith.constant dense<0.000000e+00> : vector<16xf32>
    %10 = vector.multi_reduction <add>, %9, %cst_4 [1] : vector<16x32xf32> to vector<16xf32>
    %11 = vector.shape_cast %10 : vector<16xf32> to vector<16x1xf32>
    %cst_5 = arith.constant 3.200000e+01 : f32
    %12 = vector.broadcast %cst_5 : f32 to vector<16x1xf32>
    %13 = arith.divf %11, %12 : vector<16x1xf32>
    %14 = vector.broadcast %6 : vector<16x1xf32> to vector<16x32xf32>
    %15 = arith.subf %2, %14 : vector<16x32xf32>
    %cst_6 = arith.constant 9.99999974E-6 : f32
    %16 = vector.broadcast %cst_6 : f32 to vector<16x1xf32>
    %17 = arith.addf %13, %16 : vector<16x1xf32>
    %18 = math.rsqrt %17 : vector<16x1xf32>
    %19 = vector.broadcast %18 : vector<16x1xf32> to vector<16x32xf32>
    %20 = arith.mulf %15, %19 : vector<16x32xf32>
    %c0_7 = arith.constant 0 : index
    %c0_8 = arith.constant 0 : index
    %21 = vector.load %arg3[%c0_7, %c0_8] : memref<1x32xf32, #tpu.memory_space<vmem>>, vector<1x32xf32>
    %22 = vector.broadcast %21 : vector<1x32xf32> to vector<16x32xf32>
    %23 = arith.mulf %20, %22 : vector<16x32xf32>
    %c0_9 = arith.constant 0 : index
    %c0_10 = arith.constant 0 : index
    %24 = vector.load %arg4[%c0_9, %c0_10] : memref<1x32xf32, #tpu.memory_space<vmem>>, vector<1x32xf32>
    %25 = vector.broadcast %24 : vector<1x32xf32> to vector<16x32xf32>
    %26 = arith.addf %23, %25 : vector<16x32xf32>
    %c0_11 = arith.constant 0 : index
    %c0_12 = arith.constant 0 : index
    %27 = vector.load %arg5[%c0_11, %c0_12] : memref<16x32xf32, #tpu.memory_space<vmem>>, vector<16x32xf32>
    tpu.vector_store %arg5[%c0_11, %c0_12], %26 {strides = array<i32>} : memref<16x32xf32, #tpu.memory_space<vmem>>, vector<16x32xf32>,
    return
  }
  func.func @transform_0(%arg0: i32) -> (i32, i32) {
    %c0_i32 = arith.constant 0 : i32
    %c0_i32_0 = arith.constant 0 : i32
    return %arg0, %c0_i32 : i32, i32
  }
  func.func @transform_1(%arg0: i32) -> (i32, i32) {
    %c0_i32 = arith.constant 0 : i32
    %c0_i32_0 = arith.constant 0 : i32
    return %arg0, %c0_i32 : i32, i32
  }
  func.func @transform_2(%arg0: i32) -> (i32, i32) {
    %c0_i32 = arith.constant 0 : i32
    %c0_i32_0 = arith.constant 0 : i32
    %c0_i32_1 = arith.constant 0 : i32
    return %c0_i32, %c0_i32_0 : i32, i32
  }
  func.func @transform_3(%arg0: i32) -> (i32, i32) {
    %c0_i32 = arith.constant 0 : i32
    %c0_i32_0 = arith.constant 0 : i32
    %c0_i32_1 = arith.constant 0 : i32
    return %c0_i32, %c0_i32_0 : i32, i32
  }
  func.func @transform_4(%arg0: i32) -> (i32, i32) {
    %c0_i32 = arith.constant 0 : i32
    %c0_i32_0 = arith.constant 0 : i32
    return %arg0, %c0_i32 : i32, i32
  }
}

module attributes {stable_mosaic.version = 11 : i64} {
  func.func @_linear_kernel(%arg0: i32, %arg1: i32, %arg2: i32, %arg3: memref<16x128xbf16, #tpu.memory_space<vmem>>, %arg4: memref<128x128xbf16, #tpu.memory_space<vmem>>, %arg5: memref<1x128xf32, #tpu.memory_space<vmem>>, %arg6: memref<16x128xf32, #tpu.memory_space<vmem>>, %arg7: memref<16x128xf32, #tpu.memory_space<vmem>>) attributes {dimension_semantics = [#tpu.dimension_semantics<parallel>, #tpu.dimension_semantics<parallel>, #tpu.dimension_semantics<arbitrary>], iteration_bounds = array<i64: 1, 1, 1>, scalar_prefetch = 0 : i64, scratch_operands = 1 : i64, tpu.core_type = #tpu.core_type<tc>, window_params = [{transform_indices = @transform_0, window_bounds = array<i64: 16, 128>}, {transform_indices = @transform_1, window_bounds = array<i64: 128, 128>}, {transform_indices = @transform_2, window_bounds = array<i64: 1, 128>}, {transform_indices = @transform_3, window_bounds = array<i64: 16, 128>}]} {
    %c0_i32 = arith.constant 0 : i32
    %0 = arith.cmpi eq, %arg2, %c0_i32 : i32
    %1 = arith.extui %0 : i1 to i32
    %c0_i32_0 = arith.constant 0 : i32
    %2 = arith.cmpi ne, %1, %c0_i32_0 : i32
    scf.if %2 {
      %cst_10 = arith.constant 0.000000e+00 : f32
      %12 = vector.broadcast %cst_10 : f32 to vector<16x128xf32>
      %c0_11 = arith.constant 0 : index
      %c0_12 = arith.constant 0 : index
      %13 = vector.load %arg7[%c0_11, %c0_12] : memref<16x128xf32, #tpu.memory_space<vmem>>, vector<16x128xf32>
      tpu.vector_store %arg7[%c0_11, %c0_12], %12 {strides = array<i32>} : memref<16x128xf32, #tpu.memory_space<vmem>>, vector<16x128xf32>,
    } else {
    }
    %c0 = arith.constant 0 : index
    %c0_1 = arith.constant 0 : index
    %3 = vector.load %arg7[%c0, %c0_1] : memref<16x128xf32, #tpu.memory_space<vmem>>, vector<16x128xf32>
    %c0_2 = arith.constant 0 : index
    %c0_3 = arith.constant 0 : index
    %4 = vector.load %arg3[%c0_2, %c0_3] : memref<16x128xbf16, #tpu.memory_space<vmem>>, vector<16x128xbf16>
    %c0_4 = arith.constant 0 : index
    %c0_5 = arith.constant 0 : index
    %5 = vector.load %arg4[%c0_4, %c0_5] : memref<128x128xbf16, #tpu.memory_space<vmem>>, vector<128x128xbf16>
    %cst = arith.constant dense<0.000000e+00> : vector<16x128xf32>
    %6 = tpu.matmul %4, %5, %cst {dimension_numbers = #tpu.dot_dimension_numbers<[1], [0], [0], [1], [0, 0, 1, 1], [], []>} : vector<16x128xbf16>, vector<128x128xbf16>, vector<16x128xf32> -> vector<16x128xf32>
    %7 = arith.addf %3, %6 : vector<16x128xf32>
    %c0_6 = arith.constant 0 : index
    %c0_7 = arith.constant 0 : index
    %8 = vector.load %arg7[%c0_6, %c0_7] : memref<16x128xf32, #tpu.memory_space<vmem>>, vector<16x128xf32>
    tpu.vector_store %arg7[%c0_6, %c0_7], %7 {strides = array<i32>} : memref<16x128xf32, #tpu.memory_space<vmem>>, vector<16x128xf32>,
    %c0_i32_8 = arith.constant 0 : i32
    %9 = arith.cmpi eq, %arg2, %c0_i32_8 : i32
    %10 = arith.extui %9 : i1 to i32
    %c0_i32_9 = arith.constant 0 : i32
    %11 = arith.cmpi ne, %10, %c0_i32_9 : i32
    scf.if %11 {
      %c0_10 = arith.constant 0 : index
      %c0_11 = arith.constant 0 : index
      %12 = vector.load %arg7[%c0_10, %c0_11] : memref<16x128xf32, #tpu.memory_space<vmem>>, vector<16x128xf32>
      %c0_12 = arith.constant 0 : index
      %c0_13 = arith.constant 0 : index
      %13 = vector.load %arg5[%c0_12, %c0_13] : memref<1x128xf32, #tpu.memory_space<vmem>>, vector<1x128xf32>
      %14 = vector.broadcast %13 : vector<1x128xf32> to vector<16x128xf32>
      %15 = arith.addf %12, %14 : vector<16x128xf32>
      %cst_14 = arith.constant 0.000000e+00 : f32
      %16 = vector.broadcast %cst_14 : f32 to vector<16x128xf32>
      %17 = arith.maximumf %15, %16 : vector<16x128xf32>
      %c0_15 = arith.constant 0 : index
      %c0_16 = arith.constant 0 : index
      %18 = vector.load %arg6[%c0_15, %c0_16] : memref<16x128xf32, #tpu.memory_space<vmem>>, vector<16x128xf32>
      tpu.vector_store %arg6[%c0_15, %c0_16], %17 {strides = array<i32>} : memref<16x128xf32, #tpu.memory_space<vmem>>, vector<16x128xf32>,
    } else {
    }
    return
  }
  func.func @transform_0(%arg0: i32, %arg1: i32, %arg2: i32) -> (i32, i32) {
    %c0_i32 = arith.constant 0 : i32
    return %arg0, %arg2 : i32, i32
  }
  func.func @transform_1(%arg0: i32, %arg1: i32, %arg2: i32) -> (i32, i32) {
    %c0_i32 = arith.constant 0 : i32
    return %arg2, %arg1 : i32, i32
  }
  func.func @transform_2(%arg0: i32, %arg1: i32, %arg2: i32) -> (i32, i32) {
    %c0_i32 = arith.constant 0 : i32
    %c0_i32_0 = arith.constant 0 : i32
    return %c0_i32, %arg1 : i32, i32
  }
  func.func @transform_3(%arg0: i32, %arg1: i32, %arg2: i32) -> (i32, i32) {
    %c0_i32 = arith.constant 0 : i32
    return %arg0, %arg1 : i32, i32
  }
}

module attributes {stable_mosaic.version = 11 : i64} {
  func.func @_add_ln_kernel(%arg0: i32, %arg1: memref<16x32xf32, #tpu.memory_space<vmem>>, %arg2: memref<16x32xf32, #tpu.memory_space<vmem>>, %arg3: memref<1x32xf32, #tpu.memory_space<vmem>>, %arg4: memref<1x32xf32, #tpu.memory_space<vmem>>, %arg5: memref<16x32xf32, #tpu.memory_space<vmem>>) attributes {dimension_semantics = [#tpu.dimension_semantics<parallel>], iteration_bounds = array<i64: 1>, scalar_prefetch = 0 : i64, scratch_operands = 0 : i64, tpu.core_type = #tpu.core_type<tc>, window_params = [{transform_indices = @transform_0, window_bounds = array<i64: 16, 32>}, {transform_indices = @transform_1, window_bounds = array<i64: 16, 32>}, {pipeline_mode = #tpu.pipeline_mode<synchronous>, transform_indices = @transform_2, window_bounds = array<i64: 1, 32>}, {pipeline_mode = #tpu.pipeline_mode<synchronous>, transform_indices = @transform_3, window_bounds = array<i64: 1, 32>}, {transform_indices = @transform_4, window_bounds = array<i64: 16, 32>}]} {
    %c0 = arith.constant 0 : index
    %c0_0 = arith.constant 0 : index
    %0 = vector.load %arg1[%c0, %c0_0] : memref<16x32xf32, #tpu.memory_space<vmem>>, vector<16x32xf32>
    %c0_1 = arith.constant 0 : index
    %c0_2 = arith.constant 0 : index
    %1 = vector.load %arg2[%c0_1, %c0_2] : memref<16x32xf32, #tpu.memory_space<vmem>>, vector<16x32xf32>
    %2 = arith.addf %0, %1 : vector<16x32xf32>
    %cst = arith.constant dense<0.000000e+00> : vector<16xf32>
    %3 = vector.multi_reduction <add>, %2, %cst [1] : vector<16x32xf32> to vector<16xf32>
    %4 = vector.shape_cast %3 : vector<16xf32> to vector<16x1xf32>
    %cst_3 = arith.constant 3.200000e+01 : f32
    %5 = vector.broadcast %cst_3 : f32 to vector<16x1xf32>
    %6 = arith.divf %4, %5 : vector<16x1xf32>
    %7 = vector.broadcast %6 : vector<16x1xf32> to vector<16x32xf32>
    %8 = arith.subf %2, %7 : vector<16x32xf32>
    %9 = arith.mulf %8, %8 : vector<16x32xf32>
    %cst_4 = arith.constant dense<0.000000e+00> : vector<16xf32>
    %10 = vector.multi_reduction <add>, %9, %cst_4 [1] : vector<16x32xf32> to vector<16xf32>
    %11 = vector.shape_cast %10 : vector<16xf32> to vector<16x1xf32>
    %cst_5 = arith.constant 3.200000e+01 : f32
    %12 = vector.broadcast %cst_5 : f32 to vector<16x1xf32>
    %13 = arith.divf %11, %12 : vector<16x1xf32>
    %14 = vector.broadcast %6 : vector<16x1xf32> to vector<16x32xf32>
    %15 = arith.subf %2, %14 : vector<16x32xf32>
    %cst_6 = arith.constant 9.99999974E-6 : f32
    %16 = vector.broadcast %cst_6 : f32 to vector<16x1xf32>
    %17 = arith.addf %13, %16 : vector<16x1xf32>
    %18 = math.rsqrt %17 : vector<16x1xf32>
    %19 = vector.broadcast %18 : vector<16x1xf32> to vector<16x32xf32>
    %20 = arith.mulf %15, %19 : vector<16x32xf32>
    %c0_7 = arith.constant 0 : index
    %c0_8 = arith.constant 0 : index
    %21 = vector.load %arg3[%c0_7, %c0_8] : memref<1x32xf32, #tpu.memory_space<vmem>>, vector<1x32xf32>
    %22 = vector.broadcast %21 : vector<1x32xf32> to vector<16x32xf32>
    %23 = arith.mulf %20, %22 : vector<16x32xf32>
    %c0_9 = arith.constant 0 : index
    %c0_10 = arith.constant 0 : index
    %24 = vector.load %arg4[%c0_9, %c0_10] : memref<1x32xf32, #tpu.memory_space<vmem>>, vector<1x32xf32>
    %25 = vector.broadcast %24 : vector<1x32xf32> to vector<16x32xf32>
    %26 = arith.addf %23, %25 : vector<16x32xf32>
    %c0_11 = arith.constant 0 : index
    %c0_12 = arith.constant 0 : index
    %27 = vector.load %arg5[%c0_11, %c0_12] : memref<16x32xf32, #tpu.memory_space<vmem>>, vector<16x32xf32>
    tpu.vector_store %arg5[%c0_11, %c0_12], %26 {strides = array<i32>} : memref<16x32xf32, #tpu.memory_space<vmem>>, vector<16x32xf32>,
    return
  }
  func.func @transform_0(%arg0: i32) -> (i32, i32) {
    %c0_i32 = arith.constant 0 : i32
    %c0_i32_0 = arith.constant 0 : i32
    return %arg0, %c0_i32 : i32, i32
  }
  func.func @transform_1(%arg0: i32) -> (i32, i32) {
    %c0_i32 = arith.constant 0 : i32
    %c0_i32_0 = arith.constant 0 : i32
    return %arg0, %c0_i32 : i32, i32
  }
  func.func @transform_2(%arg0: i32) -> (i32, i32) {
    %c0_i32 = arith.constant 0 : i32
    %c0_i32_0 = arith.constant 0 : i32
    %c0_i32_1 = arith.constant 0 : i32
    return %c0_i32, %c0_i32_0 : i32, i32
  }
  func.func @transform_3(%arg0: i32) -> (i32, i32) {
    %c0_i32 = arith.constant 0 : i32
    %c0_i32_0 = arith.constant 0 : i32
    %c0_i32_1 = arith.constant 0 : i32
    return %c0_i32, %c0_i32_0 : i32, i32
  }
  func.func @transform_4(%arg0: i32) -> (i32, i32) {
    %c0_i32 = arith.constant 0 : i32
    %c0_i32_0 = arith.constant 0 : i32
    return %arg0, %c0_i32 : i32, i32
  }
}

</mosaic_0001>

<bundles_post_ra>
// kernel: transformer_encoder.15
= control target key start
LH: loop header
LB: loop body
LE: loop exit
PB: predicated region body
PF: predicated region fallthrough
CT: control target
= control target key end

     0   :  { %v210_v0 = vmov 0.0   ;;  %vm211_vm0 = vmmov 0   ;;  %s268_s1 = inlined_call_operand.vmem [shape: bf16[128,128], index: 1, kind: input, shape index: {}]   ;;  %s269_s0 = inlined_call_operand.vmem [shape: bf16[16,128], index: 0, kind: input, shape index: {}]   ;;  %s270_s2 = inlined_call_operand.vmem [shape: f32[1,128], index: 2, kind: input, shape index: {}]   ;;  %s271_s3 = inlined_call_operand.vmem [shape: f32[16,128], index: 3, kind: output, shape index: {}]  }
   0x1   :  { %179 = vmatprep.subr.bf16.mxu0 %v210_v0  ;;  %v201_v1 = vld [vmem:[%s268_s1] sm:$0xff]   ;;  %195 = vmatprep.mubr.msk.bf16.mxu0 %vm211_vm0, %v210_v0  ;;  %v202_v2 = vld [vmem:[%s268_s1 + $0x8] sm:$0xff]   ;;  %v203_v3 = vld [vmem:[%s268_s1 + $0x10] sm:$0xff]  }
   0x2   :  { %180 = vmatpush3.bf16.msra.mxu0 %v201_v1  ;;  %v204_v4 = vld [vmem:[%s268_s1 + $0x18] sm:$0xff]   ;;  %v205_v5 = vld [vmem:[%s268_s1 + $0x20] sm:$0xff]   ;;  %v206_v6 = vld [vmem:[%s268_s1 + $0x28] sm:$0xff]  }
   0x3   :  { %181 = vmatprep.subr.bf16.mxu0 %v210_v0  ;;  %v207_v7 = vld [vmem:[%s268_s1 + $0x30] sm:$0xff]   ;;  %v208_v8 = vld [vmem:[%s268_s1 + $0x38] sm:$0xff]   ;;  %v209_v9 = vld [vmem:[%s269_s0] sm:$0xff]  }
   0x4   :  { %v169_v10 = vld [vmem:[%s270_s2] ss:$0 sm:$0xff] }
   0x6   :  { %182 = vmatpush3.bf16.msra.mxu0 %v202_v2 }
   0x7   :  { %183 = vmatprep.subr.bf16.mxu0 %v210_v0 }
   0xa   :  { %184 = vmatpush3.bf16.msra.mxu0 %v203_v3 }
   0xb   :  { %185 = vmatprep.subr.bf16.mxu0 %v210_v0 }
   0xe   :  { %186 = vmatpush3.bf16.msra.mxu0 %v204_v4 }
   0xf   :  { %187 = vmatprep.subr.bf16.mxu0 %v210_v0 }
  0x12   :  { %188 = vmatpush3.bf16.msra.mxu0 %v205_v5 }
  0x13   :  { %189 = vmatprep.subr.bf16.mxu0 %v210_v0 }
  0x16   :  { %190 = vmatpush3.bf16.msra.mxu0 %v206_v6 }
  0x17   :  { %191 = vmatprep.subr.bf16.mxu0 %v210_v0 }
  0x1a   :  { %192 = vmatpush3.bf16.msra.mxu0 %v207_v7 }
  0x1b   :  { %193 = vmatprep.subr.bf16.mxu0 %v210_v0 }
  0x1e   :  { %194 = vmatpush3.bf16.msra.mxu0 %v208_v8 }
  0x21   :  { %196 = vmatmul.mubr.bf16.vlgmr.msra.gmra.mrb[0].mxu0 %v209_v9 }
  0xf4   :  { %v129_v11 = vpop.f32.mrb[0].mxu0 }
  0xf5   :  { %v152_v12 = vadd.f32 %v169_v10, %v129_v11  ;;  %v197_v13 = vpop.f32.mrb[1].mxu0 }
  0xf6   :  { %v132_v14 = vpop.f32.mrb[2].mxu0 }
  0xf7   :  { %154 = vst [vmem:[%s271_s3] sm:$0xff] %v152_v12  ;;  %v153_v15 = vadd.f32 %v169_v10, %v132_v14  ;;  %v198_v16 = vpop.f32.mrb[3].mxu0 }
  0xf9   :  { %155 = vst [vmem:[%s271_s3 + $0x8] sm:$0xff] %v153_v15 }

// kernel: transformer_encoder.19
= control target key start
LH: loop header
LB: loop body
LE: loop exit
PB: predicated region body
PF: predicated region fallthrough
CT: control target
= control target key end

     0   :  { %vm23_vm0 = vcmask 261120   ;;  %s136_s0 = inlined_call_operand.vmem [shape: f32[16,32], index: 0, kind: input, shape index: {}]   ;;  %s137_s1 = inlined_call_operand.vmem [shape: f32[16,32], index: 1, kind: input, shape index: {}]   ;;  %s138_s2 = inlined_call_operand.vmem [shape: f32[1,32], index: 2, kind: input, shape index: {}]   ;;  %s139_s3 = inlined_call_operand.vmem [shape: f32[1,32], index: 3, kind: input, shape index: {}]   ;;  %s140_s4 = inlined_call_operand.vmem [shape: f32[16,32], index: 4, kind: output, shape index: {}]  }
   0x1   :  { %v17_v0 = vld [vmem:[%s136_s0] sm:$0xff]  ;;  %v18_v2 = vld [vmem:[%s136_s0 + $0x8] sm:$0xff] }
   0x2   :  { %v19_v1 = vld [vmem:[%s137_s1] sm:$0xff]  ;;  %v20_v4 = vld [vmem:[%s137_s1 + $0x8] sm:$0xff] }
   0x3   :  { %v21_v3 = vadd.f32 %v19_v1, %v17_v0  ;;  %v22_v5 = vadd.f32 %v20_v4, %v18_v2  ;;  %v75_v25 = vld [vmem:[%s138_s2] ss:$0 sm:$0xff] }
   0x4   :  { %v76_v27 = vld [vmem:[%s139_s3] ss:$0 sm:$0xff] }
   0x5   :  { %v24_v6 = vsel %vm23_vm0, %v21_v3, 0.0  ;;  %v27_v7 = vsel %vm23_vm0, %v22_v5, 0.0 }
   0x6   :  { %25 = vadd.xlane.f32.xlu0 %v24_v6 }
   0xa   :  { %28 = vadd.xlane.f32.xlu0 %v27_v7 }
  0x93   :  { %v26_v8 = vpop.xlane.xlu0 %25 }
  0x94   :  { %v31_v9 = vmul.f32 0.03125, %v26_v8 }
  0x96   :  { %v33_v10 = vsub.f32 %v21_v3, %v31_v9 }
  0x97   :  { %v29_v11 = vpop.xlane.xlu0 %28 }
  0x98   :  { %v32_v12 = vmul.f32 0.03125, %v29_v11  ;;  %v35_v13 = vmul.f32 %v33_v10, %v33_v10 }
  0x9a   :  { %v34_v14 = vsub.f32 %v22_v5, %v32_v12  ;;  %v37_v15 = vsel %vm23_vm0, %v35_v13, 0.0 }
  0x9b   :  { %38 = vadd.xlane.f32.xlu1 %v37_v15 }
  0x9c   :  { %v36_v16 = vmul.f32 %v34_v14, %v34_v14 }
  0x9e   :  { %v40_v17 = vsel %vm23_vm0, %v36_v16, 0.0 }
  0x9f   :  { %41 = vadd.xlane.f32.xlu1 %v40_v17 }
 0x128   :  { %v39_v18 = vpop.xlane.xlu1 %38 }
 0x129   :  { %v43_v19 = vmul.f32 0.03125, %v39_v18 }
 0x12b   :  { %v45_v20 = vadd.f32 1e-05, %v43_v19 }
 0x12c   :  { %v42_v21 = vpop.xlane.xlu1 %41 }
 0x12d   :  { %77 = vrsqrt.f32 %v45_v20  ;;  %v44_v22 = vmul.f32 0.03125, %v42_v21 }
 0x12f   :  { %v46_v23 = vadd.f32 1e-05, %v44_v22 }
 0x131   :  { %79 = vrsqrt.f32 %v46_v23 }
 0x137   :  { %v78_v24 = vpop.eup %77 }
 0x138   :  { %v49_v26 = vmul.f32 %v78_v24, %v33_v10 }
 0x13a   :  { %v58_v28 = vmul.f32 %v75_v25, %v49_v26 }
 0x13b   :  { %v80_v29 = vpop.eup %79 }
 0x13c   :  { %v67_v30 = vadd.f32 %v76_v27, %v58_v28  ;;  %v50_v31 = vmul.f32 %v80_v29, %v34_v14 }
 0x13e   :  { %69 = vst.msk [vmem:[%s140_s4] sm:$0xff] %vm23_vm0, %v67_v30  ;;  %v59_v32 = vmul.f32 %v75_v25, %v50_v31 }
 0x140   :  { %v68_v33 = vadd.f32 %v76_v27, %v59_v32 }
 0x142   :  { %70 = vst.msk [vmem:[%s140_s4 + $0x8] sm:$0xff] %vm23_vm0, %v68_v33 }

// kernel: transformer_encoder.17
= control target key start
LH: loop header
LB: loop body
LE: loop exit
PB: predicated region body
PF: predicated region fallthrough
CT: control target
= control target key end

     0   :  { %s888_s12 = smov 0   ;;  %s965_s0 = inlined_call_operand.vmem [shape: f32[2,4,8,8], index: 0, kind: input, shape index: {}]   ;;  %s966_s1 = inlined_call_operand.vmem [shape: f32[2,4,8,8], index: 1, kind: input, shape index: {}]   ;;  %s967_s2 = inlined_call_operand.vmem [shape: f32[2,4,8,8], index: 2, kind: input, shape index: {}]   ;;  %s968_s3 = inlined_call_operand.vmem [shape: f32[2,4,8,8], index: 3, kind: output, shape index: {}]  }
   0x1 LB: > { %s741_s13 = sadd.s32 4294967295, %s864_s12   ;;  %p745_p0 = scmp.ge.s32.totalorder %s864_s12, 1  ;;  %s864_s12 = sphi %s888_s12, %s13_s12  }
   0x2   : > { %p157_p1 = scmp.lt.s32.totalorder %s864_s12, 3 }
   0x4   : > { %p158_p2 = pnand %p745_p0, %p157_p1 }
   0x5   : > { %p191_p3 = scmp.lt.s32.totalorder (!%p158_p2), %s741_s13, 1  ;;  %v866_v0 = vmov (!%p158_p2), 0.0   ;;  %vm867_vm0 = vmmov (!%p158_p2), 0   ;;  %vm236_vm1 = vcmask (!%p158_p2), 64512   ;;  %vm476_vm2 = vcmask (!%p158_p2), 1043456  }
   0x6   : > { %161 = sbr.rel (%p158_p2) target bundleno = 784 (0x310), region = 32  ;;  %784 = vmatprep.subr.bf16.mxu0 (!%p158_p2), %v866_v0  ;;  %790 = vmatprep.subr.bf16.mxu1 (!%p158_p2), %v866_v0 }
   0x7   : > { %786 = vmatprep.mubr.msk.bf16.mxu0 (!%p158_p2), %vm867_vm0, %v866_v0  ;;  %792 = vmatprep.mubr.msk.bf16.mxu1 (!%p158_p2), %vm867_vm0, %v866_v0 }
   0xd   : > { %s970_s13 = smov (!%p191_p3, %s741_s13), 1 }
   0xe   : > { %s902_s14 = sshll.u32 %s970_s13, 5 }
   0xf   : > { %s200_s17 = scalar_lea.vmem %s966_s1, %s902_s14  ;;  %s195_s20 = scalar_lea.vmem %s965_s0, %s902_s14 }
  0x10   : > { %v220_v1 = vld [vmem:[%s200_s17] sm:$0xff]  ;;  %v221_v2 = vld [vmem:[%s200_s17 + $0x8] sm:$0xff]  ;;  %v222_v5 = vld [vmem:[%s200_s17 + $0x10] sm:$0xff]  ;;  %s205_s23 = scalar_lea.vmem %s967_s2, %s902_s14  ;;  %s210_s26 = scalar_lea.vmem %s968_s3, %s902_s14 }
  0x11   : > { %v224_v3 = vpack.c.bf16 %v220_v1, %v220_v1  ;;  %v225_v4 = vpack.c.bf16 %v221_v2, %v221_v2  ;;  %v223_v6 = vld [vmem:[%s200_s17 + $0x18] sm:$0xff]  ;;  %v212_v9 = vld [vmem:[%s195_s20] sm:$0xff]  ;;  %v213_v10 = vld [vmem:[%s195_s20 + $0x8] sm:$0xff]  ;;  %v226_v11 = vpack.c.bf16 %v222_v5, %v222_v5 }
  0x12   : > { %v227_v12 = vpack.c.bf16 %v223_v6, %v223_v6  ;;  %v216_v13 = vpack.c.bf16 %v212_v9, %v212_v9  ;;  %v217_v14 = vpack.c.bf16 %v213_v10, %v213_v10  ;;  %v214_v17 = vld [vmem:[%s195_s20 + $0x10] sm:$0xff]  ;;  %v215_v18 = vld [vmem:[%s195_s20 + $0x18] sm:$0xff]  ;;  %v228_v2 = vld [vmem:[%s205_s23] sm:$0xff] }
  0x13   : > { %v241_v7 = vsel %vm236_vm1, %v224_v3, 0  ;;  %v287_v8 = vsel %vm236_vm1, %v225_v4, 0  ;;  %v333_v15 = vsel %vm236_vm1, %v226_v11, 0  ;;  %v218_v19 = vpack.c.bf16 %v214_v17, %v214_v17  ;;  %v229_v5 = vld [vmem:[%s205_s23 + $0x8] sm:$0xff]  ;;  %v231_v11 = vld [vmem:[%s205_s23 + $0x18] sm:$0xff] }
  0x14   : > { %785 = vmatpush3.bf16.xpose.msra.mxu0 %v241_v7  ;;  %791 = vmatpush3.bf16.xpose.msra.mxu1 %v287_v8  ;;  %v379_v16 = vsel %vm236_vm1, %v227_v12, 0  ;;  %v219_v20 = vpack.c.bf16 %v215_v18, %v215_v18  ;;  %v232_v3 = vpack.c.bf16 %v228_v2, %v228_v2  ;;  %v233_v6 = vpack.c.bf16 %v229_v5, %v229_v5  ;;  %v230_v8 = vld [vmem:[%s205_s23 + $0x10] sm:$0xff] }
  0x15   : > { %796 = vmatprep.subr.bf16.mxu0 %v866_v0  ;;  %802 = vmatprep.subr.bf16.mxu1 %v866_v0  ;;  %v234_v9 = vpack.c.bf16 %v230_v8, %v230_v8  ;;  %v235_v12 = vpack.c.bf16 %v231_v11, %v231_v11 }
  0x16   : > { %v478_v4 = vsel %vm476_vm2, %v232_v3, 0  ;;  %v524_v7 = vsel %vm476_vm2, %v233_v6, 0 }
  0x17   : > { %v570_v10 = vsel %vm476_vm2, %v234_v9, 0 }
  0x1b   : > { %787 = vmatmul.mubr.msk.bf16.vlgmr.msra.gmra.mrb[0].mxu0 %vm236_vm1, %v216_v13  ;;  %793 = vmatmul.mubr.msk.bf16.vlgmr.msra.gmra.mrb[0].mxu1 %vm236_vm1, %v217_v14  ;;  %v616_v13 = vsel %vm476_vm2, %v235_v12, 0 }
  0x1c   : > { %797 = vmatpush3.bf16.xpose.msra.mxu0 %v333_v15  ;;  %803 = vmatpush3.bf16.xpose.msra.mxu1 %v379_v16 }
  0x1d   : > { %798 = vmatprep.mubr.msk.bf16.mxu0 %vm867_vm0, %v866_v0  ;;  %804 = vmatprep.mubr.msk.bf16.mxu1 %vm867_vm0, %v866_v0 }
  0x1e   : > { %808 = vmatprep.subr.bf16.mxu0 %v866_v0  ;;  %814 = vmatprep.subr.bf16.mxu1 %v866_v0 }
  0x23   : > { %799 = vmatmul.mubr.msk.bf16.vlgmr.msra.gmra.mrb[4].mxu0 %vm236_vm1, %v218_v19  ;;  %805 = vmatmul.mubr.msk.bf16.vlgmr.msra.gmra.mrb[4].mxu1 %vm236_vm1, %v219_v20 }
  0x24   : > { %810 = vmatprep.mubr.msk.bf16.mxu0 %vm867_vm0, %v866_v0  ;;  %816 = vmatprep.mubr.msk.bf16.mxu1 %vm867_vm0, %v866_v0 }
  0x25   : > { %809 = vmatpush3.bf16.msra.mxu0 %v478_v4  ;;  %815 = vmatpush3.bf16.msra.mxu1 %v524_v7 }
  0x26   : > { %820 = vmatprep.subr.bf16.mxu0 %v866_v0  ;;  %826 = vmatprep.subr.bf16.mxu1 %v866_v0 }
  0xee   : > { %v277_v21 = vpop.f32.mrb[0].mxu0  ;;  %v323_v22 = vpop.f32.mrb[0].mxu1 }
  0xef   : > { %v421_v23 = vmul.f32 0.35355338, %v277_v21  ;;  %v788_v24 = vpop.f32.mrb[1].mxu0  ;;  %v422_v25 = vmul.f32 0.35355338, %v323_v22  ;;  %v794_v26 = vpop.f32.mrb[1].mxu1 }
  0xf0   : > { %v280_v27 = vpop.f32.mrb[2].mxu0  ;;  %v326_v28 = vpop.f32.mrb[2].mxu1 }
  0xf1   : > { %v789_v29 = vpop.f32.mrb[3].mxu0  ;;  %v425_v30 = vsel %vm236_vm1, %v421_v23, -inf  ;;  %v795_v31 = vpop.f32.mrb[3].mxu1  ;;  %v428_v32 = vsel %vm236_vm1, %v422_v25, -inf }
  0xf2   : > { %426 = vmax.xlane.f32.xlu0 %v425_v30 }
  0xf6   : > { %429 = vmax.xlane.f32.xlu0 %v428_v32  ;;  %v369_v33 = vpop.f32.mrb[4].mxu0  ;;  %v415_v34 = vpop.f32.mrb[4].mxu1 }
  0xf7   : > { %v423_v35 = vmul.f32 0.35355338, %v369_v33  ;;  %v800_v36 = vpop.f32.mrb[5].mxu0  ;;  %v424_v37 = vmul.f32 0.35355338, %v415_v34  ;;  %v806_v38 = vpop.f32.mrb[5].mxu1 }
  0xf8   : > { %v372_v39 = vpop.f32.mrb[6].mxu0  ;;  %v418_v40 = vpop.f32.mrb[6].mxu1 }
  0xf9   : > { %v801_v41 = vpop.f32.mrb[7].mxu0  ;;  %v431_v42 = vsel %vm236_vm1, %v423_v35, -inf  ;;  %v807_v43 = vpop.f32.mrb[7].mxu1  ;;  %v434_v44 = vsel %vm236_vm1, %v424_v37, -inf }
  0xfa   : > { %432 = vmax.xlane.f32.xlu1 %v431_v42 }
  0xfe   : > { %435 = vmax.xlane.f32.xlu1 %v434_v44 }
 0x17f   : > { %v427_v45 = vpop.xlane.xlu0 %426 }
 0x180   : > { %v437_v46 = vsub.f32 %v421_v23, %v427_v45 }
 0x182   : > { %v441_v47 = vmul.f32 1.442695, %v437_v46 }
 0x183   : > { %v430_v48 = vpop.xlane.xlu0 %429 }
 0x184   : > { %842 = vpow2.f32 %v441_v47  ;;  %v438_v49 = vsub.f32 %v422_v25, %v430_v48 }
 0x186   : > { %v443_v50 = vmul.f32 1.442695, %v438_v49 }
 0x187   : > { %v433_v51 = vpop.xlane.xlu1 %432 }
 0x188   : > { %844 = vpow2.f32 %v443_v50  ;;  %v439_v52 = vsub.f32 %v423_v35, %v433_v51 }
 0x18a   : > { %v445_v53 = vmul.f32 1.442695, %v439_v52 }
 0x18b   : > { %v436_v54 = vpop.xlane.xlu1 %435 }
 0x18c   : > { %846 = vpow2.f32 %v445_v53  ;;  %v440_v55 = vsub.f32 %v424_v37, %v436_v54 }
 0x18e   : > { %v843_v56 = vpop.eup %842  ;;  %v447_v57 = vmul.f32 1.442695, %v440_v55 }
 0x18f   : > { %v449_v58 = vsel %vm236_vm1, %v843_v56, 0.0 }
 0x190   : > { %848 = vpow2.f32 %v447_v57  ;;  %450 = vadd.xlane.f32.xlu0 %v449_v58 }
 0x192   : > { %v845_v59 = vpop.eup %844 }
 0x193   : > { %v452_v60 = vsel %vm236_vm1, %v845_v59, 0.0 }
 0x194   : > { %453 = vadd.xlane.f32.xlu1 %v452_v60 }
 0x196   : > { %v847_v61 = vpop.eup %846 }
 0x197   : > { %v455_v62 = vsel %vm236_vm1, %v847_v61, 0.0 }
 0x198   : > { %456 = vadd.xlane.f32.xlu0 %v455_v62 }
 0x19a   : > { %v849_v63 = vpop.eup %848 }
 0x19b   : > { %v458_v1 = vsel %vm236_vm1, %v849_v63, 0.0 }
 0x19c   : > { %459 = vadd.xlane.f32.xlu1 %v458_v1 }
 0x21d   : > { %v451_v14 = vpop.xlane.xlu0 %450 }
 0x21e   : > { %850 = vrcp.f32 %v451_v14 }
 0x221   : > { %v454_v15 = vpop.xlane.xlu1 %453 }
 0x222   : > { %852 = vrcp.f32 %v454_v15 }
 0x225   : > { %v457_v16 = vpop.xlane.xlu0 %456 }
 0x226   : > { %854 = vrcp.f32 %v457_v16 }
 0x228   : > { %v851_v17 = vpop.eup %850 }
 0x229   : > { %v465_v18 = vmul.f32 %v851_v17, %v843_v56  ;;  %v460_v19 = vpop.xlane.xlu1 %459 }
 0x22a   : > { %856 = vrcp.f32 %v460_v19 }
 0x22b   : > { %v469_v20 = vpack.c.bf16 %v465_v18, %v465_v18 }
 0x22c   : > { %v853_v21 = vpop.eup %852 }
 0x22d   : > { %v466_v22 = vmul.f32 %v853_v21, %v845_v59  ;;  %811 = vmatmul.mubr.msk.bf16.vlgmr.msra.gmra.mrb[8].mxu0 %vm236_vm1, %v469_v20 }
 0x22e   : > { %821 = vmatpush3.bf16.msra.mxu0 %v570_v10  ;;  %822 = vmatprep.mubr.msk.bf16.mxu0 %vm867_vm0, %v866_v0 }
 0x22f   : > { %v470_v23 = vpack.c.bf16 %v466_v22, %v466_v22 }
 0x230   : > { %v855_v24 = vpop.eup %854 }
 0x231   : > { %v467_v25 = vmul.f32 %v855_v24, %v847_v61  ;;  %817 = vmatmul.mubr.msk.bf16.vlgmr.msra.gmra.mrb[8].mxu1 %vm236_vm1, %v470_v23 }
 0x232   : > { %827 = vmatpush3.bf16.msra.mxu1 %v616_v13  ;;  %828 = vmatprep.mubr.msk.bf16.mxu1 %vm867_vm0, %v866_v0 }
 0x233   : > { %v471_v26 = vpack.c.bf16 %v467_v25, %v467_v25 }
 0x234   : > { %v857_v27 = vpop.eup %856 }
 0x235   : > { %v468_v28 = vmul.f32 %v857_v27, %v849_v63  ;;  %823 = vmatmul.mubr.msk.bf16.vlgmr.msra.gmra.mrb[12].mxu0 %vm236_vm1, %v471_v26 }
 0x237   : > { %v472_v29 = vpack.c.bf16 %v468_v28, %v468_v28 }
 0x239   : > { %829 = vmatmul.mubr.msk.bf16.vlgmr.msra.gmra.mrb[12].mxu1 %vm236_vm1, %v472_v29 }
 0x300   : > { %v514_v30 = vpop.f32.mrb[8].mxu0 }
 0x301   : > { %658 = vst.msk [vmem:[%s210_s26] sm:$0xff] %vm236_vm1, %v514_v30  ;;  %v812_v31 = vpop.f32.mrb[9].mxu0 }
 0x302   : > { %v517_v32 = vpop.f32.mrb[10].mxu0 }
 0x303   : > { %v813_v33 = vpop.f32.mrb[11].mxu0 }
 0x304   : > { %v560_v34 = vpop.f32.mrb[8].mxu1 }
 0x305   : > { %659 = vst.msk [vmem:[%s210_s26 + $0x8] sm:$0xff] %vm236_vm1, %v560_v34  ;;  %v818_v0 = vpop.f32.mrb[9].mxu1 }
 0x306   : > { %v563_v35 = vpop.f32.mrb[10].mxu1 }
 0x307   : > { %v819_v36 = vpop.f32.mrb[11].mxu1 }
 0x308   : > { %v606_v37 = vpop.f32.mrb[12].mxu0 }
 0x309   : > { %660 = vst.msk [vmem:[%s210_s26 + $0x10] sm:$0xff] %vm236_vm1, %v606_v37  ;;  %v824_v38 = vpop.f32.mrb[13].mxu0 }
 0x30a   : > { %v609_v39 = vpop.f32.mrb[14].mxu0 }
 0x30b   : > { %v825_v40 = vpop.f32.mrb[15].mxu0 }
 0x30c   : > { %v652_v41 = vpop.f32.mrb[12].mxu1 }
 0x30d   : > { %661 = vst.msk [vmem:[%s210_s26 + $0x18] sm:$0xff] %vm236_vm1, %v652_v41  ;;  %v830_v42 = vpop.f32.mrb[13].mxu1 }
 0x30e   : > { %v655_v43 = vpop.f32.mrb[14].mxu1 }
 0x30f   : > { %v831_v44 = vpop.f32.mrb[15].mxu1 }
 0x310 PF: > { %s13_s12 = sadd.s32 1, %s864_s12  }
 0x311   : > { %p10_p4 = scmp.ge.s32.totalorder %s13_s12, 4  }
 0x313   :  { %12 = sbr.rel (!%p10_p4) target bundleno = 1 (0x1), region = 68 }

// kernel: transformer_encoder.20
= control target key start
LH: loop header
LB: loop body
LE: loop exit
PB: predicated region body
PF: predicated region fallthrough
CT: control target
= control target key end

     0   :  { %v212_v0 = vmov 0.0   ;;  %vm213_vm0 = vmmov 0   ;;  %s270_s1 = inlined_call_operand.vmem [shape: bf16[128,128], index: 1, kind: input, shape index: {}]   ;;  %s271_s0 = inlined_call_operand.vmem [shape: bf16[16,128], index: 0, kind: input, shape index: {}]   ;;  %s272_s2 = inlined_call_operand.vmem [shape: f32[1,128], index: 2, kind: input, shape index: {}]   ;;  %s273_s3 = inlined_call_operand.vmem [shape: f32[16,128], index: 3, kind: output, shape index: {}]  }
   0x1   :  { %181 = vmatprep.subr.bf16.mxu0 %v212_v0  ;;  %v203_v1 = vld [vmem:[%s270_s1] sm:$0xff]   ;;  %197 = vmatprep.mubr.msk.bf16.mxu0 %vm213_vm0, %v212_v0  ;;  %v204_v2 = vld [vmem:[%s270_s1 + $0x8] sm:$0xff]   ;;  %v205_v3 = vld [vmem:[%s270_s1 + $0x10] sm:$0xff]  }
   0x2   :  { %182 = vmatpush3.bf16.msra.mxu0 %v203_v1  ;;  %v206_v4 = vld [vmem:[%s270_s1 + $0x18] sm:$0xff]   ;;  %v207_v5 = vld [vmem:[%s270_s1 + $0x20] sm:$0xff]   ;;  %v208_v6 = vld [vmem:[%s270_s1 + $0x28] sm:$0xff]  }
   0x3   :  { %183 = vmatprep.subr.bf16.mxu0 %v212_v0  ;;  %v209_v7 = vld [vmem:[%s270_s1 + $0x30] sm:$0xff]   ;;  %v210_v8 = vld [vmem:[%s270_s1 + $0x38] sm:$0xff]   ;;  %v211_v9 = vld [vmem:[%s271_s0] sm:$0xff]  }
   0x4   :  { %v171_v10 = vld [vmem:[%s272_s2] ss:$0 sm:$0xff] }
   0x6   :  { %184 = vmatpush3.bf16.msra.mxu0 %v204_v2 }
   0x7   :  { %185 = vmatprep.subr.bf16.mxu0 %v212_v0 }
   0xa   :  { %186 = vmatpush3.bf16.msra.mxu0 %v205_v3 }
   0xb   :  { %187 = vmatprep.subr.bf16.mxu0 %v212_v0 }
   0xe   :  { %188 = vmatpush3.bf16.msra.mxu0 %v206_v4 }
   0xf   :  { %189 = vmatprep.subr.bf16.mxu0 %v212_v0 }
  0x12   :  { %190 = vmatpush3.bf16.msra.mxu0 %v207_v5 }
  0x13   :  { %191 = vmatprep.subr.bf16.mxu0 %v212_v0 }
  0x16   :  { %192 = vmatpush3.bf16.msra.mxu0 %v208_v6 }
  0x17   :  { %193 = vmatprep.subr.bf16.mxu0 %v212_v0 }
  0x1a   :  { %194 = vmatpush3.bf16.msra.mxu0 %v209_v7 }
  0x1b   :  { %195 = vmatprep.subr.bf16.mxu0 %v212_v0 }
  0x1e   :  { %196 = vmatpush3.bf16.msra.mxu0 %v210_v8 }
  0x21   :  { %198 = vmatmul.mubr.bf16.vlgmr.msra.gmra.mrb[0].mxu0 %v211_v9 }
  0xf4   :  { %v129_v11 = vpop.f32.mrb[0].mxu0 }
  0xf5   :  { %v152_v12 = vadd.f32 %v171_v10, %v129_v11  ;;  %v199_v13 = vpop.f32.mrb[1].mxu0 }
  0xf6   :  { %v132_v14 = vpop.f32.mrb[2].mxu0 }
  0xf7   :  { %v154_v15 = vmax.f32 %v152_v12, 0.0  ;;  %v153_v16 = vadd.f32 %v171_v10, %v132_v14  ;;  %v200_v17 = vpop.f32.mrb[3].mxu0 }
  0xf9   :  { %156 = vst [vmem:[%s273_s3] sm:$0xff] %v154_v15  ;;  %v155_v18 = vmax.f32 %v153_v16, 0.0 }
  0xfb   :  { %157 = vst [vmem:[%s273_s3 + $0x8] sm:$0xff] %v155_v18 }

// kernel: transformer_encoder.29
= control target key start
LH: loop header
LB: loop body
LE: loop exit
PB: predicated region body
PF: predicated region fallthrough
CT: control target
= control target key end

     0   :  { %vm24_vm0 = vcmask 261120   ;;  %s185_s0 = inlined_call_operand.vmem [shape: f32[16,32], index: 0, kind: input, shape index: {}]   ;;  %s186_s1 = inlined_call_operand.vmem [shape: f32[16,32], index: 1, kind: input, shape index: {}]   ;;  %s187_s2 = inlined_call_operand.vmem [shape: f32[1,32], index: 2, kind: input, shape index: {}]   ;;  %s188_s3 = inlined_call_operand.vmem [shape: f32[1,32], index: 3, kind: input, shape index: {}]   ;;  %s189_s4 = inlined_call_operand.hbm [shape: f32[16,32], index: 4, kind: output, shape index: {}]  }
   0x1   :  { %v18_v0 = vld [vmem:[%s185_s0] sm:$0xff]  ;;  %v19_v2 = vld [vmem:[%s185_s0 + $0x8] sm:$0xff] }
   0x2   :  { %v20_v1 = vld [vmem:[%s186_s1] sm:$0xff]  ;;  %v21_v4 = vld [vmem:[%s186_s1 + $0x8] sm:$0xff] }
   0x3   :  { %v22_v3 = vadd.f32 %v20_v1, %v18_v0 }
   0x4   :  { %9 = vsyncpa [#allocation3], 0  ;;  %v23_v5 = vadd.f32 %v21_v4, %v19_v2  ;;  %v88_v25 = vld [vmem:[%s187_s2] ss:$0 sm:$0xff]  ;;  %s121_s25 = smov [#allocation2]  }
   0x5   :  { %v25_v6 = vsel %vm24_vm0, %v22_v3, 0.0  ;;  %v89_v27 = vld [vmem:[%s188_s3] ss:$0 sm:$0xff]  ;;  %s77_s26 = sshll.u32 %s121_s25, 4  ;;  %s78_s26 = int_to_ptr.vmem [resolvable:$true] %s77_s26 }
   0x6   :  { %26 = vadd.xlane.f32.xlu0 %v25_v6  ;;  %v28_v7 = vsel %vm24_vm0, %v23_v5, 0.0  ;;  %s97_s27 = scalar_lea.vmem %s78_s26, 256  ;;  %p102_p1 = scmp.lt.s32.totalorder %s78_s26, %s78_s26 }
   0x7   :  { %p98_p0 = scmp.ne.s32.totalorder %s78_s26, %s97_s27  ;;  %p103_p2 = scmp.lt.s32.totalorder %s97_s27, %s97_s27 }
   0x9   :  { %p104_p3 = por %p103_p2, %p102_p1 }
   0xa   :  { %29 = vadd.xlane.f32.xlu0 %v28_v7 }
   0xb   :  { %p105_p4 = pnand %p104_p3, %p98_p0 }
  0x93   :  { %v27_v8 = vpop.xlane.xlu0 %26 }
  0x94   :  { %v32_v9 = vmul.f32 0.03125, %v27_v8 }
  0x96   :  { %v34_v10 = vsub.f32 %v22_v3, %v32_v9 }
  0x97   :  { %v30_v11 = vpop.xlane.xlu0 %29 }
  0x98   :  { %v33_v12 = vmul.f32 0.03125, %v30_v11  ;;  %v36_v13 = vmul.f32 %v34_v10, %v34_v10 }
  0x9a   :  { %v35_v14 = vsub.f32 %v23_v5, %v33_v12  ;;  %v38_v15 = vsel %vm24_vm0, %v36_v13, 0.0 }
  0x9b   :  { %39 = vadd.xlane.f32.xlu1 %v38_v15 }
  0x9c   :  { %v37_v16 = vmul.f32 %v35_v14, %v35_v14 }
  0x9e   :  { %v41_v17 = vsel %vm24_vm0, %v37_v16, 0.0 }
  0x9f   :  { %42 = vadd.xlane.f32.xlu1 %v41_v17 }
 0x128   :  { %v40_v18 = vpop.xlane.xlu1 %39 }
 0x129   :  { %v44_v19 = vmul.f32 0.03125, %v40_v18 }
 0x12b   :  { %v46_v20 = vadd.f32 1e-05, %v44_v19 }
 0x12c   :  { %v43_v21 = vpop.xlane.xlu1 %42 }
 0x12d   :  { %93 = vrsqrt.f32 %v46_v20  ;;  %v45_v22 = vmul.f32 0.03125, %v43_v21 }
 0x12f   :  { %v47_v23 = vadd.f32 1e-05, %v45_v22 }
 0x131   :  { %95 = vrsqrt.f32 %v47_v23 }
 0x137   :  { %v94_v24 = vpop.eup %93 }
 0x138   :  { %v50_v26 = vmul.f32 %v94_v24, %v34_v10 }
 0x13a   :  { %v59_v28 = vmul.f32 %v88_v25, %v50_v26 }
 0x13b   :  { %v96_v29 = vpop.eup %95 }
 0x13c   :  { %v51_v30 = vmul.f32 %v96_v29, %v35_v14  ;;  %v68_v31 = vadd.f32 %v89_v27, %v59_v28 }
 0x13e   :  { %v60_v32 = vmul.f32 %v88_v25, %v51_v30  ;;  %70 = vst.msk [vmem:[#allocation2] sm:$0xff] %vm24_vm0, %v68_v31 }
 0x140   :  { %v69_v33 = vadd.f32 %v89_v27, %v60_v32 }
 0x142   :  { %71 = vst.msk [vmem:[#allocation2 + $0x8] sm:$0xff] %vm24_vm0, %v69_v33 }
 0x143   :  { %108 = shalt.err (!%p105_p4)
}
 0x144   :  { %s109_s28 = scalar_lea.hbm %s189_s4, 256 }
 0x145   :  { %p110_p5 = scmp.ne.s32.totalorder %s189_s4, %s109_s28  ;;  %p113_p6 = scmp.lt.u32.totalorder %s109_s28, %s189_s4 }
 0x147   :  { %p115_p7 = pnand %p113_p6, %p110_p5 }
 0x149   :  { %118 = shalt.err (!%p115_p7)
}
 0x14a   :  { %s122_s7 = smov 128   ;;  %s123_s8 = smov 8  }
 0x14b   :  { %83 = dma.vmem_to_hbm [thread:$0]  %s78_s26, 256, %s189_s4, [#allocation3], %s122_s7, %s122_s7, %s123_s8  }
 0x14c   :  { %119 = dma.done.wait [#allocation3], 256  }
 0x14d   :  { %120 = vsyncadd [#allocation3], 4294967040 }
 0x14e   :  { %87 = vsyncpa [#allocation3], 1 }

</bundles_post_ra>
